<compile_context>
chip_gen: v7x
topology: tpu7x:2x2x1
jax: 0.10.0
libtpu: 0.0.40
codegen_flags: <defaults>
</compile_context>

<pallas_src>
import functools

import jax
import jax.numpy as jnp
from jax import lax
from jax.experimental import pallas as pl
from jax.experimental.pallas import tpu as pltpu


def _residual_block_kernel(x_ref, w1_ref, b1_ref, w2_ref, b2_ref, o_ref, *,
                           width):
    """One (C, T) slab: conv1+bn1+relu -> conv2+bn2+relu -> + residual.

    x_ref : (C, T)   f32   activations; lanes = flattened H*W positions
    w1_ref: (O, 3C)  bf16  bn1-folded conv1 weights, width taps stacked on K
    b1_ref: (O, 1)   f32   bn1-folded bias
    w2_ref: (O, 3O)  bf16  bn2-folded conv2 weights
    b2_ref: (O, 1)   f32   bn2-folded bias
    o_ref : (O, T)   f32
    """
    _, t = x_ref.shape

    # Width coordinate of every lane.  Tiles start at a multiple of `width`,
    # so the local position index mod width equals the global width index.
    wcol = lax.broadcasted_iota(jnp.int32, (1, t), 1) % width
    at_left = wcol == 0            # zero-padding column for the w-1 tap
    at_right = wcol == width - 1   # zero-padding column for the w+1 tap

    def conv1x3_bn_relu(act, w_ref, b_ref):
        # act: (ch, T) f32.  The 1x3 / pad-1 conv is a single K=3*ch matmul:
        # lane-rolled tap copies (XLU) are masked at width (= image-row)
        # boundaries and stacked along sublanes; the MXU contracts all taps
        # of all channels at once in bf16 with f32 accumulation.
        left = jnp.where(at_left, 0.0, pltpu.roll(act, 1, 1))        # act[:, p-1]
        right = jnp.where(at_right, 0.0, pltpu.roll(act, t - 1, 1))  # act[:, p+1]
        taps = jnp.concatenate([left, act, right], axis=0)           # (3*ch, T)
        out = jnp.dot(w_ref[...], taps.astype(jnp.bfloat16),
                      preferred_element_type=jnp.float32)            # (O, T) f32
        return jnp.maximum(out + b_ref[...], 0.0)   # folded-BN bias + ReLU (f32)

    x = x_ref[...]                                   # f32; also the residual
    h = conv1x3_bn_relu(x, w1_ref, b1_ref)
    y = conv1x3_bn_relu(h, w2_ref, b2_ref)
    o_ref[...] = y + x                               # identity residual, f32


def _pick_pos_tile(hw, width, cin, cout, n_batch, target_bytes=8 << 20):
    """Largest spatial tile that is a multiple of `width`, divides H*W, is
    lane-aligned (multiple of 128 or the full row), and whose rough per-step
    VMEM footprint stays under `target_bytes`."""
    bytes_per_pos = (
        4 * 2 * (cin + cout)        # double-buffered f32 input/output blocks
        + 4 * 3 * (cin + cout)      # f32 tap stacks for both convs
        + 2 * 3 * (cin + cout)      # bf16 matmul operands
        + 4 * 4 * cout              # rolled copies / conv outputs / residual sum
    )
    cap = max(width, target_bytes // bytes_per_pos)
    valid = sorted(t for t in range(width, hw + 1, width)
                   if hw % t == 0 and (t % 128 == 0 or t == hw))
    fitting = [t for t in valid if t <= cap]
    tile = max(fitting) if fitting else valid[0]
    # Keep at least two grid steps so dual-TensorCore parts (v7x) can shard
    # the "parallel" grid across cores.
    if n_batch * (hw // tile) < 2:
        smaller = [t for t in valid if t < tile]
        if smaller:
            tile = max(smaller)
    return tile


def residual_block_forward(x, w1, g1, be1, rm1, rv1, w2, g2, be2, rm2, rv2,
                           *, eps=1e-5, pos_tile=None):
    """x: (N, C, H, W) f32; conv weights (O, C, 1, 3); BN params (O,).

    Returns (N, O, H, W) f32 == relu(bn2(conv2(relu(bn1(conv1(x)))))) + x.
    """
    N, C, H, W = x.shape
    O = w1.shape[0]
    assert w1.shape == (O, C, 1, 3) and w2.shape == (O, O, 1, 3)
    assert C == O, "identity residual path requires in_channels == out_channels"
    # TODO(synk): stride != 1 / optional `downsample` projection not implemented.
    # TODO(synk): BatchNorm uses inference-mode running statistics (folded into
    #             the convs); training-mode batch statistics are not computed.
    HW = H * W

    # Fold BN (y = (conv - mean) * gamma/sqrt(var+eps) + beta) into the convs,
    # stack the 3 width taps along K ([o, k*C + c]) and pre-cast to bf16.
    s1 = g1 / jnp.sqrt(rv1 + eps)
    s2 = g2 / jnp.sqrt(rv2 + eps)
    w1t = jnp.transpose(w1[:, :, 0, :] * s1[:, None, None], (0, 2, 1))
    w2t = jnp.transpose(w2[:, :, 0, :] * s2[:, None, None], (0, 2, 1))
    w1t = w1t.reshape(O, 3 * C).astype(jnp.bfloat16)
    w2t = w2t.reshape(O, 3 * O).astype(jnp.bfloat16)
    b1 = (be1 - rm1 * s1).reshape(O, 1).astype(jnp.float32)
    b2 = (be2 - rm2 * s2).reshape(O, 1).astype(jnp.float32)

    # Metadata-only view of NCHW: channels -> sublanes, flattened H*W -> lanes.
    # No transpose / pad HBM copies on either side of the kernel.
    xf = x.reshape(N, C, HW)

    if pos_tile is None:
        pos_tile = _pick_pos_tile(HW, W, C, O, N)
    assert HW % pos_tile == 0 and pos_tile % W == 0, (HW, W, pos_tile)
    assert pos_tile % 128 == 0 or pos_tile == HW, pos_tile

    kernel = functools.partial(_residual_block_kernel, width=W)

    out = pl.pallas_call(
        kernel,
        out_shape=jax.ShapeDtypeStruct((N, O, HW), jnp.float32),
        grid_spec=pltpu.PrefetchScalarGridSpec(
            num_scalar_prefetch=0,
            grid=(N, HW // pos_tile),
            in_specs=[
                pl.BlockSpec((None, C, pos_tile), lambda n, j: (n, 0, j)),
                pl.BlockSpec((O, 3 * C), lambda n, j: (0, 0)),
                pl.BlockSpec((O, 1), lambda n, j: (0, 0)),
                pl.BlockSpec((O, 3 * O), lambda n, j: (0, 0)),
                pl.BlockSpec((O, 1), lambda n, j: (0, 0)),
            ],
            out_specs=pl.BlockSpec((None, O, pos_tile), lambda n, j: (n, 0, j)),
        ),
        compiler_params=pltpu.CompilerParams(
            dimension_semantics=("parallel", "parallel"),
            # Above the 16/32 MiB scoped defaults, with headroom vs v7x's
            # 64 MiB physical VMEM; the tile picker targets ~8 MiB per step.
            vmem_limit_bytes=48 * 1024 * 1024),
    )(xf, w1t, b1, w2t, b2)

    return out.reshape(N, O, H, W)


def residual_block_reference(x, w1, g1, be1, rm1, rv1, w2, g2, be2, rm2, rv2,
                             eps=1e-5):
    """Pure-JAX/XLA reference (f32, HIGHEST precision) of the PyTorch forward."""
    dn = ('NCHW', 'OIHW', 'NCHW')

    def bn(o, g, b, m, v):
        s = g / jnp.sqrt(v + eps)
        return o * s[None, :, None, None] + (b - m * s)[None, :, None, None]

    h = lax.conv_general_dilated(x, w1, (1, 1), [(0, 0), (1, 1)],
                                 dimension_numbers=dn,
                                 precision=lax.Precision.HIGHEST)
    h = jnp.maximum(bn(h, g1, be1, rm1, rv1), 0.0)
    y = lax.conv_general_dilated(h, w2, (1, 1), [(0, 0), (1, 1)],
                                 dimension_numbers=dn,
                                 precision=lax.Precision.HIGHEST)
    y = jnp.maximum(bn(y, g2, be2, rm2, rv2), 0.0)
    return y + x


if __name__ == "__main__":
    # Small shapes consistent with the module: N=2, C_in=C_out=32, H=16, W=16.
    N, C, H, W = 2, 32, 16, 16
    O = C

    key = jax.random.PRNGKey(0)
    ks = jax.random.split(key, 11)
    x = jax.random.normal(ks[0], (N, C, H, W), jnp.float32)

    bound = 1.0 / (C * 3) ** 0.5     # PyTorch Conv2d default init bound
    w1 = jax.random.uniform(ks[1], (O, C, 1, 3), jnp.float32, -bound, bound)
    w2 = jax.random.uniform(ks[2], (O, O, 1, 3), jnp.float32, -bound, bound)
    g1 = jax.random.uniform(ks[3], (O,), jnp.float32, 0.8, 1.2)
    g2 = jax.random.uniform(ks[4], (O,), jnp.float32, 0.8, 1.2)
    be1 = 0.1 * jax.random.normal(ks[5], (O,), jnp.float32)
    be2 = 0.1 * jax.random.normal(ks[6], (O,), jnp.float32)
    rm1 = 0.1 * jax.random.normal(ks[7], (O,), jnp.float32)
    rm2 = 0.1 * jax.random.normal(ks[8], (O,), jnp.float32)
    rv1 = jax.random.uniform(ks[9], (O,), jnp.float32, 0.8, 1.2)
    rv2 = jax.random.uniform(ks[10], (O,), jnp.float32, 0.8, 1.2)

    args = (x, w1, g1, be1, rm1, rv1, w2, g2, be2, rm2, rv2)
    out = jax.block_until_ready(jax.jit(residual_block_forward)(*args))
    ref = residual_block_reference(*args)

    assert out.shape == (N, O, H, W), out.shape
    # bf16 matmul operands + f32 accumulation vs an f32 HIGHEST reference:
    # observed error is a few 1e-3, so 1e-2 is tight enough to catch a wrong
    # tap/weight alignment (which would be O(1) off) yet robust to rounding.
    err = float(jnp.max(jnp.abs(out - ref)))
    assert jnp.allclose(out, ref, atol=1e-2, rtol=1e-2), err

    print("KERNEL_OK")
</pallas_src>

<mosaic_0001>
module attributes {stable_mosaic.version = 11 : i64} {
  func.func @_residual_block_kernel(%arg0: i32, %arg1: i32, %arg2: memref<1x32x256xf32, #tpu.memory_space<vmem>>, %arg3: memref<32x96xbf16, #tpu.memory_space<vmem>>, %arg4: memref<32x1xf32, #tpu.memory_space<vmem>>, %arg5: memref<32x96xbf16, #tpu.memory_space<vmem>>, %arg6: memref<32x1xf32, #tpu.memory_space<vmem>>, %arg7: memref<1x32x256xf32, #tpu.memory_space<vmem>>) attributes {dimension_semantics = [#tpu.dimension_semantics<parallel>, #tpu.dimension_semantics<parallel>], iteration_bounds = array<i64: 2, 1>, scalar_prefetch = 0 : i64, scratch_operands = 0 : i64, tpu.core_type = #tpu.core_type<tc>, window_params = [{transform_indices = @transform_0, window_bounds = array<i64: 1, 32, 256>}, {pipeline_mode = #tpu.pipeline_mode<synchronous>, transform_indices = @transform_1, window_bounds = array<i64: 32, 96>}, {pipeline_mode = #tpu.pipeline_mode<synchronous>, transform_indices = @transform_2, window_bounds = array<i64: 32, 1>}, {pipeline_mode = #tpu.pipeline_mode<synchronous>, transform_indices = @transform_3, window_bounds = array<i64: 32, 96>}, {pipeline_mode = #tpu.pipeline_mode<synchronous>, transform_indices = @transform_4, window_bounds = array<i64: 32, 1>}, {transform_indices = @transform_5, window_bounds = array<i64: 1, 32, 256>}]} {
    %0 = tpu.iota {dimensions = array<i32: 1>} : vector<1x256xi32>
    %c16_i32 = arith.constant 16 : i32
    %c0_i32 = arith.constant 0 : i32
    %1 = arith.cmpi eq, %c16_i32, %c0_i32 : i32
    %c1_i32 = arith.constant 1 : i32
    %2 = arith.select %1, %c1_i32, %c16_i32 : i32
    %3 = vector.broadcast %2 : i32 to vector<1x256xi32>
    %4 = arith.remsi %0, %3 : vector<1x256xi32>
    %c0_i32_0 = arith.constant 0 : i32
    %5 = vector.broadcast %c0_i32_0 : i32 to vector<1x256xi32>
    %6 = arith.cmpi ne, %4, %5 : vector<1x256xi32>
    %c0_i32_1 = arith.constant 0 : i32
    %7 = vector.broadcast %c0_i32_1 : i32 to vector<1x256xi32>
    %8 = arith.cmpi slt, %4, %7 : vector<1x256xi32>
    %c0_i32_2 = arith.constant 0 : i32
    %9 = arith.cmpi slt, %2, %c0_i32_2 : i32
    %10 = vector.broadcast %9 : i1 to vector<1x256xi1>
    %11 = vector.broadcast %10 : vector<1x256xi1> to vector<1x256xi1>
    %12 = arith.xori %8, %11 : vector<1x256xi1>
    %13 = arith.andi %12, %6 : vector<1x256xi1>
    %14 = vector.broadcast %2 : i32 to vector<1x256xi32>
    %15 = arith.addi %4, %14 : vector<1x256xi32>
    %16 = arith.select %13, %15, %4 : vector<1x256xi1>, vector<1x256xi32>
    %c0_i32_3 = arith.constant 0 : i32
    %17 = vector.broadcast %c0_i32_3 : i32 to vector<1x256xi32>
    %18 = arith.cmpi eq, %16, %17 : vector<1x256xi32>
    %c15_i32 = arith.constant 15 : i32
    %19 = vector.broadcast %c15_i32 : i32 to vector<1x256xi32>
    %20 = arith.cmpi eq, %16, %19 : vector<1x256xi32>
    %c0 = arith.constant 0 : index
    %c0_4 = arith.constant 0 : index
    %c0_5 = arith.constant 0 : index
    %21 = vector.load %arg2[%c0, %c0_4, %c0_5] : memref<1x32x256xf32, #tpu.memory_space<vmem>>, vector<1x32x256xf32>
    %22 = vector.shape_cast %21 : vector<1x32x256xf32> to vector<32x256xf32>
    %c1_i32_6 = arith.constant 1 : i32
    %23 = tpu.dynamic_rotate %22 by %c1_i32_6 dim 1 : vector<32x256xf32>, i32 -> vector<32x256xf32>
    %cst = arith.constant 0.000000e+00 : f32
    %24 = vector.shape_cast %18 : vector<1x256xi1> to vector<1x256xi1>
    %25 = vector.broadcast %24 : vector<1x256xi1> to vector<32x256xi1>
    %26 = vector.broadcast %cst : f32 to vector<32x256xf32>
    %27 = arith.select %25, %26, %23 : vector<32x256xi1>, vector<32x256xf32>
    %c255_i32 = arith.constant 255 : i32
    %28 = tpu.dynamic_rotate %22 by %c255_i32 dim 1 : vector<32x256xf32>, i32 -> vector<32x256xf32>
    %cst_7 = arith.constant 0.000000e+00 : f32
    %29 = vector.shape_cast %20 : vector<1x256xi1> to vector<1x256xi1>
    %30 = vector.broadcast %29 : vector<1x256xi1> to vector<32x256xi1>
    %31 = vector.broadcast %cst_7 : f32 to vector<32x256xf32>
    %32 = arith.select %30, %31, %28 : vector<32x256xi1>, vector<32x256xf32>
    %33 = tpu.concatenate %27, %22, %32 in 0 : vector<32x256xf32>, vector<32x256xf32>, vector<32x256xf32> -> vector<96x256xf32>
    %c0_8 = arith.constant 0 : index
    %c0_9 = arith.constant 0 : index
    %34 = vector.load %arg3[%c0_8, %c0_9] : memref<32x96xbf16, #tpu.memory_space<vmem>>, vector<32x96xbf16>
    %35 = arith.truncf %33 : vector<96x256xf32> to vector<96x256xbf16>
    %cst_10 = arith.constant dense<0.000000e+00> : vector<32x256xf32>
    %36 = tpu.matmul %34, %35, %cst_10 {dimension_numbers = #tpu.dot_dimension_numbers<[1], [0], [0], [1], [0, 0, 1, 1], [], []>} : vector<32x96xbf16>, vector<96x256xbf16>, vector<32x256xf32> -> vector<32x256xf32>
    %c0_11 = arith.constant 0 : index
    %c0_12 = arith.constant 0 : index
    %37 = vector.load %arg4[%c0_11, %c0_12] : memref<32x1xf32, #tpu.memory_space<vmem>>, vector<32x1xf32>
    %38 = vector.broadcast %37 : vector<32x1xf32> to vector<32x256xf32>
    %39 = arith.addf %36, %38 : vector<32x256xf32>
    %cst_13 = arith.constant 0.000000e+00 : f32
    %40 = vector.broadcast %cst_13 : f32 to vector<32x256xf32>
    %41 = arith.maximumf %39, %40 : vector<32x256xf32>
    %c1_i32_14 = arith.constant 1 : i32
    %42 = tpu.dynamic_rotate %41 by %c1_i32_14 dim 1 : vector<32x256xf32>, i32 -> vector<32x256xf32>
    %cst_15 = arith.constant 0.000000e+00 : f32
    %43 = vector.shape_cast %18 : vector<1x256xi1> to vector<1x256xi1>
    %44 = vector.broadcast %43 : vector<1x256xi1> to vector<32x256xi1>
    %45 = vector.broadcast %cst_15 : f32 to vector<32x256xf32>
    %46 = arith.select %44, %45, %42 : vector<32x256xi1>, vector<32x256xf32>
    %c255_i32_16 = arith.constant 255 : i32
    %47 = tpu.dynamic_rotate %41 by %c255_i32_16 dim 1 : vector<32x256xf32>, i32 -> vector<32x256xf32>
    %cst_17 = arith.constant 0.000000e+00 : f32
    %48 = vector.shape_cast %20 : vector<1x256xi1> to vector<1x256xi1>
    %49 = vector.broadcast %48 : vector<1x256xi1> to vector<32x256xi1>
    %50 = vector.broadcast %cst_17 : f32 to vector<32x256xf32>
    %51 = arith.select %49, %50, %47 : vector<32x256xi1>, vector<32x256xf32>
    %52 = tpu.concatenate %46, %41, %51 in 0 : vector<32x256xf32>, vector<32x256xf32>, vector<32x256xf32> -> vector<96x256xf32>
    %c0_18 = arith.constant 0 : index
    %c0_19 = arith.constant 0 : index
    %53 = vector.load %arg5[%c0_18, %c0_19] : memref<32x96xbf16, #tpu.memory_space<vmem>>, vector<32x96xbf16>
    %54 = arith.truncf %52 : vector<96x256xf32> to vector<96x256xbf16>
    %cst_20 = arith.constant dense<0.000000e+00> : vector<32x256xf32>
    %55 = tpu.matmul %53, %54, %cst_20 {dimension_numbers = #tpu.dot_dimension_numbers<[1], [0], [0], [1], [0, 0, 1, 1], [], []>} : vector<32x96xbf16>, vector<96x256xbf16>, vector<32x256xf32> -> vector<32x256xf32>
    %c0_21 = arith.constant 0 : index
    %c0_22 = arith.constant 0 : index
    %56 = vector.load %arg6[%c0_21, %c0_22] : memref<32x1xf32, #tpu.memory_space<vmem>>, vector<32x1xf32>
    %57 = vector.broadcast %56 : vector<32x1xf32> to vector<32x256xf32>
    %58 = arith.addf %55, %57 : vector<32x256xf32>
    %cst_23 = arith.constant 0.000000e+00 : f32
    %59 = vector.broadcast %cst_23 : f32 to vector<32x256xf32>
    %60 = arith.maximumf %58, %59 : vector<32x256xf32>
    %61 = arith.addf %60, %22 : vector<32x256xf32>
    %c0_24 = arith.constant 0 : index
    %c0_25 = arith.constant 0 : index
    %c0_26 = arith.constant 0 : index
    %62 = vector.load %arg7[%c0_24, %c0_25, %c0_26] : memref<1x32x256xf32, #tpu.memory_space<vmem>>, vector<1x32x256xf32>
    %63 = vector.shape_cast %62 : vector<1x32x256xf32> to vector<32x256xf32>
    %64 = vector.shape_cast %61 : vector<32x256xf32> to vector<1x32x256xf32>
    tpu.vector_store %arg7[%c0_24, %c0_25, %c0_26], %64 {strides = array<i32>} : memref<1x32x256xf32, #tpu.memory_space<vmem>>, vector<1x32x256xf32>,
    return
  }
  func.func @transform_0(%arg0: i32, %arg1: i32) -> (i32, i32, i32) {
    %c0_i32 = arith.constant 0 : i32
    %c0_i32_0 = arith.constant 0 : i32
    return %arg0, %c0_i32, %arg1 : i32, i32, i32
  }
  func.func @transform_1(%arg0: i32, %arg1: i32) -> (i32, i32) {
    %c0_i32 = arith.constant 0 : i32
    %c0_i32_0 = arith.constant 0 : i32
    %c0_i32_1 = arith.constant 0 : i32
    return %c0_i32, %c0_i32_0 : i32, i32
  }
  func.func @transform_2(%arg0: i32, %arg1: i32) -> (i32, i32) {
    %c0_i32 = arith.constant 0 : i32
    %c0_i32_0 = arith.constant 0 : i32
    %c0_i32_1 = arith.constant 0 : i32
    return %c0_i32, %c0_i32_0 : i32, i32
  }
  func.func @transform_3(%arg0: i32, %arg1: i32) -> (i32, i32) {
    %c0_i32 = arith.constant 0 : i32
    %c0_i32_0 = arith.constant 0 : i32
    %c0_i32_1 = arith.constant 0 : i32
    return %c0_i32, %c0_i32_0 : i32, i32
  }
  func.func @transform_4(%arg0: i32, %arg1: i32) -> (i32, i32) {
    %c0_i32 = arith.constant 0 : i32
    %c0_i32_0 = arith.constant 0 : i32
    %c0_i32_1 = arith.constant 0 : i32
    return %c0_i32, %c0_i32_0 : i32, i32
  }
  func.func @transform_5(%arg0: i32, %arg1: i32) -> (i32, i32, i32) {
    %c0_i32 = arith.constant 0 : i32
    %c0_i32_0 = arith.constant 0 : i32
    return %arg0, %c0_i32, %arg1 : i32, i32, i32
  }
}

</mosaic_0001>

<bundles_post_ra>
// kernel: residual_block_forward.1
= control target key start
LH: loop header
LB: loop body
LE: loop exit
PB: predicated region body
PF: predicated region fallthrough
CT: control target
= control target key end

     0   :  { %s1055_s18 = smov 0   ;;  %s1057_s19 = smov 0   ;;  %s1334_s0 = inlined_call_operand.vmem [shape: f32[2,32,256], index: 0, kind: input, shape index: {}]   ;;  %s1335_s1 = inlined_call_operand.vmem [shape: bf16[32,96], index: 1, kind: input, shape index: {}]   ;;  %s1336_s2 = inlined_call_operand.vmem [shape: f32[32,1], index: 2, kind: input, shape index: {}]   ;;  %s1337_s3 = inlined_call_operand.vmem [shape: bf16[32,96], index: 3, kind: input, shape index: {}]   ;;  %s1338_s4 = inlined_call_operand.vmem [shape: f32[32,1], index: 4, kind: input, shape index: {}]   ;;  %s1339_s5 = inlined_call_operand.vmem [shape: f32[2,32,256], index: 5, kind: output, shape index: {}]  }
   0x1   :  { %s1059_s20 = smov 0  }
   0x2 LB: > { %s27_s21 = sadd.s32 1, %s1016_s19  ;;  %p784_p0 = scmp.ge.s32.totalorder %s1020_s20, 1  ;;  %s1020_s20 = sphi %s1059_s20, %s15_s20   ;;  %s1016_s19 = sphi %s1057_s19, %s1349_s19   ;;  %s1012_s18 = sphi %s1055_s18, %s1348_s18  }
   0x3   : > { %p29_p1 = scmp.ge.s32.totalorder %s27_s21, 2  ;;  %p208_p2 = scmp.lt.s32.totalorder %s1020_s20, 3 }
   0x5   : > { %s1351_s21 = smov (%p29_p1, %s27_s21), 0  ;;  %p209_p3 = pnand %p784_p0, %p208_p2 }
   0x6   : > { %p245_p4 = scmp.lt.s32.totalorder (!%p209_p3), %s1012_s18, 1  ;;  %s1022_s26 = smov (!%p209_p3), 1   ;;  %v1024_v12 = vmov (!%p209_p3), 0   ;;  %v394_v13 = vld [vmem:[%s1336_s2] sm:$0xff] (!%p209_p3)  ;;  %v395_v14 = vld [vmem:[%s1336_s2 + $0x8] sm:$0xff] (!%p209_p3)  ;;  %v396_v15 = vld [vmem:[%s1336_s2 + $0x10] sm:$0xff] (!%p209_p3)  ;;  %v265_v17 = vlaneseq (!%p209_p3) }
   0x7   : > { %212 = sbr.rel (%p209_p3) target bundleno = 768 (0x300), region = 40  ;;  %s1023_s27 = smov (!%p209_p3), 127   ;;  %467 = vmatprep.mubr.bf16.mxu0 (!%p209_p3), %v1024_v12  ;;  %952 = vset.pattern.permute.xlu0 (!%p209_p3), %v1024_v12  ;;  %v397_v16 = vld [vmem:[%s1336_s2 + $0x18] sm:$0xff] (!%p209_p3)  ;;  %vm428_vm10 = vcmask (!%p209_p3), 785408  }
   0x8   : > { %953 = vset.pattern.permute.xlu1 (!%p209_p3), %v1024_v12  ;;  %648 = vmatprep.mubr.bf16.mxu1 (!%p209_p3), %v1024_v12  ;;  %v1129_v18 = vand.u32 (!%p209_p3), 127, %v265_v17 }
   0xa   : > { %v267_v19 = vadd.s32 (!%p209_p3), 128, %v1129_v18  ;;  %v272_v23 = vand.u32 (!%p209_p3), 15, %v1129_v18  ;;  %vm320_vm0 = vcmp.lt.s32.totalorder (!%p209_p3), %v1129_v18, 1  ;;  %vm357_vm5 = vcmp.lt.s32.totalorder (!%p209_p3), %v1129_v18, 127  ;;  %v997_v18 = vld [vmem:[%s1337_s3 + $0x8] sm:$0xff] (!%p209_p3)  }
   0xc   : > { %v279_v22 = vand.u32 (!%p209_p3), 15, %v267_v19  ;;  %vm882_vm2 = vcmp.ne.s32.totalorder (!%p209_p3), %v272_v23, 0  ;;  %vm884_vm8 = vcmp.ne.s32.totalorder (!%p209_p3), %v272_v23, 15  ;;  %v994_v23 = vld [vmem:[%s1335_s1] sm:$0xff] (!%p209_p3)  }
   0xd   : > { %vm1150_vm4 = vmpackc.low (!%p209_p3), %vm882_vm2, %vm882_vm2 }
   0xe   : > { %s1353_s18 = smov (!%p245_p4, %s1012_s18), 1  ;;  %vm881_vm1 = vcmp.ne.s32.totalorder %v279_v22, 0  ;;  %vm883_vm6 = vcmp.ne.s32.totalorder %v279_v22, 15  ;;  %vm1197_vm9 = vmpackc.low %vm884_vm8, %vm884_vm8 }
   0xf   : > { %s879_s22 = sshll.u32 %s1353_s18, 6  ;;  %vm1142_vm3 = vmpackc.low %vm881_vm1, %vm881_vm1 }
  0x10   : > { %s252_s25 = scalar_lea.vmem %s1334_s0, %s879_s22  ;;  %vm1187_vm7 = vmpackc.low %vm883_vm6, %vm883_vm6  ;;  %s1307_s9 = scalar_lea.vmem %s1339_s5, %s879_s22 }
  0x11   : > { %v1081_v0 = vld [vmem:[%s252_s25 + $0x20] sm:$0xff]  ;;  %v1083_v1 = vld [vmem:[%s252_s25 + $0x30] sm:$0xff]  ;;  %v1091_v5 = vld [vmem:[%s252_s25 + $0x28] sm:$0xff] }
  0x12   : > { %v1085_v2 = vld [vmem:[%s252_s25] sm:$0xff]  ;;  %v922_v3 = vpack.i.bf16 %v1083_v1, %v1081_v0  ;;  %v1089_v4 = vld [vmem:[%s252_s25 + $0x10] sm:$0xff]  ;;  %v1093_v6 = vld [vmem:[%s252_s25 + $0x38] sm:$0xff] }
  0x13   : > { %v912_v7 = vpack.i.bf16 %v1089_v4, %v1085_v2  ;;  %v1097_v8 = vld [vmem:[%s252_s25 + $0x8] sm:$0xff]  ;;  %v1099_v9 = vld [vmem:[%s252_s25 + $0x18] sm:$0xff]  ;;  %v927_v10 = vpack.i.bf16 %v1093_v6, %v1091_v5  ;;  %v386_v57 = vpack.c.bf16 %v1089_v4, %v1085_v2  ;;  %v389_v60 = vpack.c.bf16 %v1093_v6, %v1091_v5 }
  0x14   : > { %923 = vrot.lane.b32.xlu1 %v922_v3, %s1022_s26  ;;  %v917_v11 = vpack.i.bf16 %v1099_v9, %v1097_v8  ;;  %v387_v49 = vpack.c.bf16 %v1099_v9, %v1097_v8 }
  0x15   : > { %913 = vrot.lane.b32.xlu0 %v912_v7, %s1022_s26 }
  0x18   : > { %928 = vrot.lane.b32.xlu1 %v927_v10, %s1022_s26 }
  0x19   : > { %918 = vrot.lane.b32.xlu0 %v917_v11, %s1022_s26 }
  0x1c   : > { %938 = vrot.lane.b32.xlu1 %v917_v11, %s1023_s27 }
  0x1d   : > { %933 = vrot.lane.b32.xlu0 %v912_v7, %s1023_s27  ;;  %v388_v7 = vpack.c.bf16 %v1083_v1, %v1081_v0 }
  0x20   : > { %948 = vrot.lane.b32.xlu1 %v927_v10, %s1023_s27 }
  0x21   : > { %943 = vrot.lane.b32.xlu0 %v922_v3, %s1023_s27 }
  0x24   : > { %405 = vperm.xlu1 %953, %v395_v14  }
  0x25   : > { %400 = vperm.xlu0 %952, %v394_v13  }
  0x28   : > { %410 = vperm.xlu1 %953, %v396_v15  }
  0x29   : > { %415 = vperm.xlu0 %952, %v397_v16  }
  0x86   : > { %v924_v20 = vpop.permute.xlu1 %923 }
  0x87   : > { %v914_v21 = vpop.permute.xlu0 %913  ;;  %v926_v24 = vunpack.i.h.bf16 %v924_v20  ;;  %v925_v25 = vunpack.i.l.bf16 %v924_v20 }
  0x88   : > { %v916_v30 = vunpack.i.h.bf16 %v914_v21  ;;  %v915_v31 = vunpack.i.l.bf16 %v914_v21 }
  0x8a   : > { %v929_v26 = vpop.permute.xlu1 %928 }
  0x8b   : > { %v931_v27 = vunpack.i.h.bf16 %v929_v26  ;;  %v930_v28 = vunpack.i.l.bf16 %v929_v26  ;;  %v919_v29 = vpop.permute.xlu0 %918 }
  0x8c   : > { %v921_v32 = vunpack.i.h.bf16 %v919_v29  ;;  %v920_v33 = vunpack.i.l.bf16 %v919_v29 }
  0x8d   : > { %v323_v34 = vsel %vm320_vm0, %v925_v25, %v930_v28  ;;  %v324_v35 = vsel %vm320_vm0, %v926_v24, %v931_v27  ;;  %v327_v46 = vsel %vm320_vm0, %v930_v28, %v925_v25  ;;  %v328_v47 = vsel %vm320_vm0, %v931_v27, %v926_v24  ;;  %v995_v25 = vld [vmem:[%s1335_s1 + $0x8] sm:$0xff]  }
  0x8e   : > { %v321_v36 = vsel %vm320_vm0, %v915_v31, %v920_v33  ;;  %v322_v37 = vsel %vm320_vm0, %v916_v30, %v921_v32  ;;  %v325_v40 = vsel %vm320_vm0, %v920_v33, %v915_v31  ;;  %v326_v41 = vsel %vm320_vm0, %v921_v32, %v916_v30  ;;  %v939_v43 = vpop.permute.xlu1 %938 }
  0x8f   : > { %v794_v39 = vpack.c.bf16 %v322_v37, %v321_v36  ;;  %v934_v44 = vpop.permute.xlu0 %933  ;;  %v799_v45 = vpack.c.bf16 %v326_v41, %v325_v40  ;;  %v804_v48 = vpack.c.bf16 %v324_v35, %v323_v34  ;;  %v941_v50 = vunpack.i.h.bf16 %v939_v43 }
  0x90   : > { %v940_v51 = vunpack.i.l.bf16 %v939_v43  ;;  %v936_v52 = vunpack.i.h.bf16 %v934_v44  ;;  %v935_v53 = vunpack.i.l.bf16 %v934_v44  ;;  %v809_v54 = vpack.c.bf16 %v328_v47, %v327_v46 }
  0x91   : > { %795 = vmatprep.subr.msk.bf16.mxu0 %vm1142_vm3, %v794_v39 }
  0x92   : > { %800 = vmatpush1.bf16.msk.msra.mxu0 %vm1150_vm4, %v799_v45  ;;  %v949_v55 = vpop.permute.xlu1 %948  ;;  %v363_v58 = vsel %vm357_vm5, %v941_v50, %v936_v52  ;;  %v362_v59 = vsel %vm357_vm5, %v940_v51, %v935_v53  ;;  %v359_v10 = vsel %vm357_vm5, %v936_v52, %v941_v50  ;;  %v358_v11 = vsel %vm357_vm5, %v935_v53, %v940_v51 }
  0x93   : > { %805 = vmatprep.subr.msk.bf16.mxu0 %vm1142_vm3, %v804_v48  ;;  %v944_v56 = vpop.permute.xlu0 %943  ;;  %v951_v61 = vunpack.i.h.bf16 %v949_v55  ;;  %v950_v62 = vunpack.i.l.bf16 %v949_v55  ;;  %v814_v13 = vpack.c.bf16 %v363_v58, %v362_v59  ;;  %v819_v17 = vpack.c.bf16 %v359_v10, %v358_v11  ;;  %v578_v10 = vld [vmem:[%s1338_s4 + $0x10] sm:$0xff]  ;;  %v579_v11 = vld [vmem:[%s1338_s4 + $0x18] sm:$0xff] }
  0x94   : > { %v946_v63 = vunpack.i.h.bf16 %v944_v56  ;;  %v945_v3 = vunpack.i.l.bf16 %v944_v56 }
  0x96   : > { %810 = vmatpush1.bf16.msk.msra.mxu0 %vm1150_vm4, %v809_v54  ;;  %v365_v14 = vsel %vm357_vm5, %v951_v61, %v946_v63  ;;  %v364_v15 = vsel %vm357_vm5, %v950_v62, %v945_v3  ;;  %v361_v19 = vsel %vm357_vm5, %v946_v63, %v951_v61  ;;  %v360_v20 = vsel %vm357_vm5, %v945_v3, %v950_v62  ;;  %v576_v3 = vld [vmem:[%s1338_s4] sm:$0xff] }
  0x97   : > { %439 = vmatprep.subr.bf16.mxu0 %v387_v49  ;;  %v824_v21 = vpack.c.bf16 %v365_v14, %v364_v15  ;;  %v829_v24 = vpack.c.bf16 %v361_v19, %v360_v20 }
  0x9a   : > { %440 = vmatpush1.bf16.msra.mxu0 %v386_v57 }
  0x9b   : > { %441 = vmatprep.subr.bf16.mxu0 %v389_v60 }
  0x9e   : > { %442 = vmatpush1.bf16.msra.mxu0 %v388_v7  ;;  %v577_v7 = vld [vmem:[%s1338_s4 + $0x8] sm:$0xff] }
  0x9f   : > { %815 = vmatprep.subr.msk.bf16.mxu0 %vm1187_vm7, %v814_v13 }
  0xa2   : > { %820 = vmatpush1.bf16.msk.msra.mxu0 %vm1197_vm9, %v819_v17 }
  0xa3   : > { %825 = vmatprep.subr.msk.bf16.mxu0 %vm1187_vm7, %v824_v21  ;;  %v406_v28 = vpop.permute.xlu1 %405 }
  0xa4   : > { %v401_v26 = vpop.permute.xlu0 %400 }
  0xa6   : > { %830 = vmatpush1.bf16.msk.msra.mxu0 %vm1197_vm9, %v829_v24 }
  0xa7   : > { %v411_v41 = vpop.permute.xlu1 %410 }
  0xa8   : > { %v416_v50 = vpop.permute.xlu0 %415 }
  0xa9   : > { %831 = vmatmul.mubr.msk.bf16.vlgmr.msra.gmra.mrb[0].mxu0 %vm428_vm10, %v994_v23 }
  0xaa   : > { %477 = vmatprep.mubr.bf16.mxu0 %v1024_v12 }
  0xb1   : > { %832 = vmatmul.mubr.msk.bf16.gmra.mrb[4].mxu0 %vm428_vm10, %v995_v25 }
 0x17c   : > { %v469_v27 = vpop.f32.mrb[0].mxu0 }
 0x17d   : > { %v470_v29 = vadd.f32 %v469_v27, %v401_v26  ;;  %v471_v30 = vpop.f32.mrb[1].mxu0 }
 0x17e   : > { %v472_v31 = vadd.f32 %v471_v30, %v401_v26  ;;  %v473_v32 = vpop.f32.mrb[2].mxu0 }
 0x17f   : > { %v474_v33 = vadd.f32 %v473_v32, %v406_v28  ;;  %v475_v34 = vpop.f32.mrb[3].mxu0  ;;  %v488_v36 = vmax.f32 %v470_v29, 0.0 }
 0x180   : > { %v476_v35 = vadd.f32 %v475_v34, %v406_v28  ;;  %v489_v39 = vmax.f32 %v472_v31, 0.0 }
 0x181   : > { %v490_v37 = vmax.f32 %v474_v33, 0.0 }
 0x182   : > { %v491_v40 = vmax.f32 %v476_v35, 0.0 }
 0x183   : > { %v954_v43 = vpack.i.bf16 %v490_v37, %v488_v36  ;;  %v1216_v44 = vpack.c.bf16 %v490_v37, %v488_v36 }
 0x184   : > { %v479_v45 = vpop.f32.mrb[4].mxu0  ;;  %v959_v46 = vpack.i.bf16 %v491_v40, %v489_v39  ;;  %v1218_v47 = vpack.c.bf16 %v491_v40, %v489_v39 }
 0x185   : > { %v480_v48 = vadd.f32 %v479_v45, %v411_v41  ;;  %v481_v49 = vpop.f32.mrb[5].mxu0  ;;  %955 = vrot.lane.b32.xlu1 %v954_v43, %s1022_s26 }
 0x186   : > { %v482_v51 = vadd.f32 %v481_v49, %v411_v41  ;;  %v483_v52 = vpop.f32.mrb[6].mxu0  ;;  %960 = vrot.lane.b32.xlu0 %v959_v46, %s1022_s26 }
 0x187   : > { %v484_v53 = vadd.f32 %v483_v52, %v416_v50  ;;  %v485_v54 = vpop.f32.mrb[7].mxu0  ;;  %v492_v56 = vmax.f32 %v480_v48, 0.0 }
 0x188   : > { %v486_v55 = vadd.f32 %v485_v54, %v416_v50  ;;  %v493_v58 = vmax.f32 %v482_v51, 0.0 }
 0x189   : > { %v494_v57 = vmax.f32 %v484_v53, 0.0 }
 0x18a   : > { %v495_v59 = vmax.f32 %v486_v55, 0.0 }
 0x18b   : > { %v964_v60 = vpack.i.bf16 %v494_v57, %v492_v56  ;;  %v1222_v61 = vpack.c.bf16 %v494_v57, %v492_v56 }
 0x18c   : > { %v969_v62 = vpack.i.bf16 %v495_v59, %v493_v58  ;;  %v571_v63 = vpack.c.bf16 %v495_v59, %v493_v58 }
 0x18d   : > { %965 = vrot.lane.b32.xlu1 %v964_v60, %s1022_s26 }
 0x18e   : > { %970 = vrot.lane.b32.xlu0 %v969_v62, %s1022_s26 }
 0x191   : > { %975 = vrot.lane.b32.xlu1 %v954_v43, %s1023_s27 }
 0x192   : > { %980 = vrot.lane.b32.xlu0 %v959_v46, %s1023_s27 }
 0x195   : > { %985 = vrot.lane.b32.xlu1 %v964_v60, %s1023_s27 }
 0x196   : > { %990 = vrot.lane.b32.xlu0 %v969_v62, %s1023_s27 }
 0x199   : > { %582 = vperm.xlu1 %953, %v576_v3  }
 0x19a   : > { %587 = vperm.xlu0 %952, %v577_v7  }
 0x19d   : > { %592 = vperm.xlu1 %953, %v578_v10  }
 0x19e   : > { %597 = vperm.xlu0 %952, %v579_v11  }
 0x1f7   : > { %v956_v13 = vpop.permute.xlu1 %955 }
 0x1f8   : > { %v958_v14 = vunpack.i.h.bf16 %v956_v13  ;;  %v957_v15 = vunpack.i.l.bf16 %v956_v13  ;;  %v961_v17 = vpop.permute.xlu0 %960 }
 0x1f9   : > { %v963_v19 = vunpack.i.h.bf16 %v961_v17  ;;  %v962_v20 = vunpack.i.l.bf16 %v961_v17 }
 0x1fb   : > { %v512_v21 = vsel %vm320_vm0, %v957_v15, %v962_v20  ;;  %v513_v24 = vsel %vm320_vm0, %v958_v14, %v963_v19  ;;  %v516_v23 = vsel %vm320_vm0, %v962_v20, %v957_v15  ;;  %v517_v25 = vsel %vm320_vm0, %v963_v19, %v958_v14 }
 0x1fc   : > { %v838_v26 = vpack.c.bf16 %v513_v24, %v512_v21  ;;  %v843_v27 = vpack.c.bf16 %v517_v25, %v516_v23 }
 0x1fe   : > { %839 = vmatprep.subr.msk.bf16.mxu1 %vm1142_vm3, %v838_v26 }
 0x1ff   : > { %v966_v28 = vpop.permute.xlu1 %965  ;;  %844 = vmatpush1.bf16.msk.msra.mxu1 %vm1150_vm4, %v843_v27 }
 0x200   : > { %v968_v29 = vunpack.i.h.bf16 %v966_v28  ;;  %v967_v30 = vunpack.i.l.bf16 %v966_v28  ;;  %v971_v31 = vpop.permute.xlu0 %970 }
 0x201   : > { %v973_v32 = vunpack.i.h.bf16 %v971_v31  ;;  %v972_v33 = vunpack.i.l.bf16 %v971_v31 }
 0x203   : > { %v514_v34 = vsel %vm320_vm0, %v967_v30, %v972_v33  ;;  %v515_v35 = vsel %vm320_vm0, %v968_v29, %v973_v32  ;;  %v518_v36 = vsel %vm320_vm0, %v972_v33, %v967_v30  ;;  %v519_v37 = vsel %vm320_vm0, %v973_v32, %v968_v29  ;;  %v976_v39 = vpop.permute.xlu1 %975 }
 0x204   : > { %v848_v40 = vpack.c.bf16 %v515_v35, %v514_v34  ;;  %v853_v41 = vpack.c.bf16 %v519_v37, %v518_v36  ;;  %v981_v43 = vpop.permute.xlu0 %980  ;;  %v978_v45 = vunpack.i.h.bf16 %v976_v39  ;;  %v977_v46 = vunpack.i.l.bf16 %v976_v39 }
 0x205   : > { %v983_v48 = vunpack.i.h.bf16 %v981_v43  ;;  %v982_v49 = vunpack.i.l.bf16 %v981_v43 }
 0x206   : > { %849 = vmatprep.subr.msk.bf16.mxu1 %vm1142_vm3, %v848_v40 }
 0x207   : > { %854 = vmatpush1.bf16.msk.msra.mxu1 %vm1150_vm4, %v853_v41  ;;  %v986_v50 = vpop.permute.xlu1 %985  ;;  %v548_v52 = vsel %vm357_vm5, %v982_v49, %v977_v46  ;;  %v549_v53 = vsel %vm357_vm5, %v983_v48, %v978_v45  ;;  %v544_v38 = vsel %vm357_vm5, %v977_v46, %v982_v49  ;;  %v545_v42 = vsel %vm357_vm5, %v978_v45, %v983_v48 }
 0x208   : > { %v991_v51 = vpop.permute.xlu0 %990  ;;  %620 = vmatprep.subr.bf16.mxu1 %v1218_v47  ;;  %v988_v54 = vunpack.i.h.bf16 %v986_v50  ;;  %v987_v55 = vunpack.i.l.bf16 %v986_v50  ;;  %v858_v47 = vpack.c.bf16 %v549_v53, %v548_v52 }
 0x209   : > { %v993_v56 = vunpack.i.h.bf16 %v991_v51  ;;  %v992_v57 = vunpack.i.l.bf16 %v991_v51 }
 0x20b   : > { %621 = vmatpush1.bf16.msra.mxu1 %v1216_v44  ;;  %v550_v58 = vsel %vm357_vm5, %v992_v57, %v987_v55  ;;  %v551_v59 = vsel %vm357_vm5, %v993_v56, %v988_v54  ;;  %v863_v44 = vpack.c.bf16 %v545_v42, %v544_v38  ;;  %v546_v60 = vsel %vm357_vm5, %v987_v55, %v992_v57 }
 0x20c   : > { %622 = vmatprep.subr.bf16.mxu1 %v571_v63  ;;  %v547_v62 = vsel %vm357_vm5, %v988_v54, %v993_v56  ;;  %v868_v63 = vpack.c.bf16 %v551_v59, %v550_v58 }
 0x20d   : > { %v873_v3 = vpack.c.bf16 %v547_v62, %v546_v60 }
 0x20f   : > { %623 = vmatpush1.bf16.msra.mxu1 %v1222_v61  ;;  %v996_v61 = vld [vmem:[%s1337_s3] sm:$0xff]  }
 0x210   : > { %859 = vmatprep.subr.msk.bf16.mxu1 %vm1187_vm7, %v858_v47 }
 0x213   : > { %864 = vmatpush1.bf16.msk.msra.mxu1 %vm1197_vm9, %v863_v44 }
 0x214   : > { %869 = vmatprep.subr.msk.bf16.mxu1 %vm1187_vm7, %v868_v63 }
 0x217   : > { %874 = vmatpush1.bf16.msk.msra.mxu1 %vm1197_vm9, %v873_v3 }
 0x218   : > { %v583_v16 = vpop.permute.xlu1 %582 }
 0x219   : > { %v588_v13 = vpop.permute.xlu0 %587 }
 0x21a   : > { %875 = vmatmul.mubr.msk.bf16.vlgmr.msra.gmra.mrb[0].mxu1 %vm428_vm10, %v996_v61 }
 0x21b   : > { %658 = vmatprep.mubr.bf16.mxu1 %v1024_v12 }
 0x21c   : > { %v593_v27 = vpop.permute.xlu1 %592 }
 0x21d   : > { %v598_v32 = vpop.permute.xlu0 %597 }
 0x222   : > { %876 = vmatmul.mubr.msk.bf16.gmra.mrb[4].mxu1 %vm428_vm10, %v997_v18 }
 0x2ed   : > { %v650_v7 = vpop.f32.mrb[0].mxu1 }
 0x2ee   : > { %v651_v10 = vadd.f32 %v650_v7, %v583_v16  ;;  %v652_v11 = vpop.f32.mrb[1].mxu1 }
 0x2ef   : > { %v653_v14 = vadd.f32 %v652_v11, %v583_v16  ;;  %v654_v15 = vpop.f32.mrb[2].mxu1 }
 0x2f0   : > { %v669_v22 = vmax.f32 %v651_v10, 0.0  ;;  %v655_v17 = vadd.f32 %v654_v15, %v588_v13  ;;  %v656_v19 = vpop.f32.mrb[3].mxu1 }
 0x2f1   : > { %v670_v12 = vmax.f32 %v653_v14, 0.0  ;;  %v657_v20 = vadd.f32 %v656_v19, %v588_v13 }
 0x2f2   : > { %v677_v21 = vadd.f32 %v669_v22, %v1085_v2  ;;  %v671_v24 = vmax.f32 %v655_v17, 0.0 }
 0x2f3   : > { %v678_v23 = vadd.f32 %v670_v12, %v1097_v8  ;;  %v672_v25 = vmax.f32 %v657_v20, 0.0 }
 0x2f4   : > { %685 = vst [vmem:[%s1307_s9] sm:$0xff] %v677_v21  ;;  %v679_v26 = vadd.f32 %v671_v24, %v1089_v4 }
 0x2f5   : > { %686 = vst [vmem:[%s1307_s9 + $0x8] sm:$0xff] %v678_v23  ;;  %v680_v28 = vadd.f32 %v672_v25, %v1099_v9  ;;  %v660_v29 = vpop.f32.mrb[4].mxu1 }
 0x2f6   : > { %687 = vst [vmem:[%s1307_s9 + $0x10] sm:$0xff] %v679_v26  ;;  %v661_v30 = vadd.f32 %v660_v29, %v593_v27  ;;  %v662_v31 = vpop.f32.mrb[5].mxu1 }
 0x2f7   : > { %688 = vst [vmem:[%s1307_s9 + $0x18] sm:$0xff] %v680_v28  ;;  %v663_v2 = vadd.f32 %v662_v31, %v593_v27  ;;  %v664_v8 = vpop.f32.mrb[6].mxu1 }
 0x2f8   : > { %v673_v33 = vmax.f32 %v661_v30, 0.0  ;;  %v665_v34 = vadd.f32 %v664_v8, %v598_v32  ;;  %v666_v35 = vpop.f32.mrb[7].mxu1 }
 0x2f9   : > { %v674_v4 = vmax.f32 %v663_v2, 0.0  ;;  %v667_v36 = vadd.f32 %v666_v35, %v598_v32 }
 0x2fa   : > { %v681_v37 = vadd.f32 %v673_v33, %v1081_v0  ;;  %v675_v9 = vmax.f32 %v665_v34, 0.0 }
 0x2fb   : > { %v682_v39 = vadd.f32 %v674_v4, %v1091_v5  ;;  %v676_v40 = vmax.f32 %v667_v36, 0.0 }
 0x2fc   : > { %689 = vst [vmem:[%s1307_s9 + $0x20] sm:$0xff] %v681_v37  ;;  %v683_v41 = vadd.f32 %v675_v9, %v1083_v1 }
 0x2fd   : > { %690 = vst [vmem:[%s1307_s9 + $0x28] sm:$0xff] %v682_v39  ;;  %v684_v43 = vadd.f32 %v676_v40, %v1093_v6 }
 0x2fe   : > { %691 = vst [vmem:[%s1307_s9 + $0x30] sm:$0xff] %v683_v41 }
 0x2ff   : > { %692 = vst [vmem:[%s1307_s9 + $0x38] sm:$0xff] %v684_v43 }
 0x300 PF: > { %s15_s20 = sadd.s32 1, %s1020_s20   ;;  %s1348_s18 = smov %s1016_s19 }
 0x301   : > { %p12_p5 = scmp.ge.s32.totalorder %s15_s20, 4   ;;  %s1349_s19 = smov %s1351_s21 }
 0x303   :  { %14 = sbr.rel (!%p12_p5) target bundleno = 2 (0x2), region = 70 }

</bundles_post_ra>
